<compile_context>
chip_gen: v6e
topology: v6e:2x2x1
jax: 0.10.0
libtpu: 0.0.40
codegen_flags: <defaults>
</compile_context>

<pallas_src>
import functools

import jax
import jax.numpy as jnp
from jax import lax
from jax.experimental import pallas as pl
from jax.experimental.pallas import tpu as pltpu


def _topk_mean_scalar(lm, topk):
    # lm: (B, J) non-negative per-(sample, joint) losses, joints on the lane axis.
    # Returns mean_b( sum(top-k per row) / topk ) as a (1, 1) f32 array.
    B, J = lm.shape
    acc = jnp.zeros((B, 1), jnp.float32)
    work = lm
    for _ in range(topk):                       # static unroll, single XLU reduce/step
        m = jnp.max(work, axis=-1, keepdims=True)    # (B, 1)
        acc = acc + m
        # Retire current maxima by zeroing (losses >= 0), never -inf: safe even
        # when > J - topk joints tie at exactly 0.0 (zero target weights).
        work = jnp.where(work == m, 0.0, work)
    return jnp.sum(acc, axis=0, keepdims=True) * (1.0 / (topk * B))


def _ohkm_kernel_w(w_ref, pred_ref, gt_ref, out_ref, *, topk):
    # w_ref:    (B, J)      target weights (not squared)
    # pred_ref: (B, J, HW)  predicted heatmaps
    # gt_ref:   (B, J, HW)  ground-truth heatmaps
    # out_ref:  (1, 1)      scalar OHKM loss
    hw = pred_ref.shape[-1]
    # Subtract in native dtype (bf16 stays bf16 on v6e/v7x; f32 is a no-op cast),
    # upcast for square/accumulate.
    d = (pred_ref[...] - gt_ref[...]).astype(jnp.float32)
    row = jnp.sum(d * d, axis=-1)                               # (B, J)
    w = w_ref[...].astype(jnp.float32)                          # (B, J)
    lm = row * (w * w * (0.5 / hw))                             # fold weight + scale
    out_ref[...] = _topk_mean_scalar(lm, topk)


def _ohkm_kernel_nw(pred_ref, gt_ref, out_ref, *, topk):
    hw = pred_ref.shape[-1]
    d = (pred_ref[...] - gt_ref[...]).astype(jnp.float32)
    lm = jnp.sum(d * d, axis=-1) * (0.5 / hw)                   # (B, J)
    out_ref[...] = _topk_mean_scalar(lm, topk)


def joints_ohkm_mse_loss(output, target, target_weight=None,
                         use_target_weight=True, topk=8):
    B, J, H, W = output.shape
    HW = H * W
    assert topk <= J, "topk must be <= num_joints"

    # Contiguous (free) reshapes only — no transpose, no dtype cast in the wrapper.
    pred = output.reshape(B, J, HW)
    gt = target.reshape(B, J, HW)

    vmem = pl.BlockSpec(memory_space=pltpu.MemorySpace.VMEM)
    itemsize = jnp.dtype(output.dtype).itemsize
    cost = pl.CostEstimate(
        flops=3 * B * J * HW + 10 * B * J,
        transcendentals=0,
        bytes_accessed=2 * B * J * HW * itemsize + B * J * 4 + 4,
    )
    out_shape = jax.ShapeDtypeStruct((1, 1), jnp.float32)
    out_spec = pl.BlockSpec(memory_space=pltpu.MemorySpace.VMEM)

    if use_target_weight:
        w = target_weight.reshape(B, J)                         # 2-D, lane-dense-ish
        out = pl.pallas_call(
            functools.partial(_ohkm_kernel_w, topk=topk),
            out_shape=out_shape,
            in_specs=[vmem, vmem, vmem],
            out_specs=out_spec,
            cost_estimate=cost,
        )(w, pred, gt)
    else:
        # Compile-time specialization: no weight input, no dead multiply.
        out = pl.pallas_call(
            functools.partial(_ohkm_kernel_nw, topk=topk),
            out_shape=out_shape,
            in_specs=[vmem, vmem],
            out_specs=out_spec,
            cost_estimate=cost,
        )(pred, gt)
    return out[0, 0]

# TODO(synk): for production shapes where (B, J, HW) exceeds scoped VMEM
# (esp. v7x: 64 MiB physical / 32 MiB default), tile the grid over batch with
# dimension_semantics=("parallel",) (keeps all J in-block so top-k stays
# intra-block, and shards across v7x's 2 TensorCores), accumulating per-row
# top-k means into a small output; on v5e/v6e simply raising vmem_limit_bytes
# also works up to 128 MiB physical.


def _reference(output, target, target_weight, use_target_weight=True, topk=8):
    # Pure-JAX reference mirroring the PyTorch module.
    B, J, H, W = output.shape
    pred = output.reshape(B, J, -1).astype(jnp.float32)
    gt = target.reshape(B, J, -1).astype(jnp.float32)
    if use_target_weight:
        w = target_weight.reshape(B, J, 1).astype(jnp.float32)
    else:
        w = jnp.ones((B, J, 1), jnp.float32)
    l = 0.5 * jnp.mean((pred * w - gt * w) ** 2, axis=2)        # (B, J)
    tk = lax.top_k(l, topk)[0]                                  # (B, topk)
    return jnp.mean(jnp.sum(tk, axis=1) / topk)


if __name__ == "__main__":
    key = jax.random.PRNGKey(0)
    k1, k2, k3 = jax.random.split(key, 3)

    B, J, H, W = 4, 16, 16, 16
    topk = 8
    output = jax.random.normal(k1, (B, J, H, W), dtype=jnp.float32)
    target = jax.random.normal(k2, (B, J, H, W), dtype=jnp.float32)
    target_weight = jax.random.uniform(k3, (B, J, 1), dtype=jnp.float32)

    # Weighted path.
    loss = joints_ohkm_mse_loss(output, target, target_weight,
                                use_target_weight=True, topk=topk)
    loss = jax.block_until_ready(loss)
    ref = _reference(output, target, target_weight, True, topk)
    assert jnp.allclose(loss, ref, rtol=1e-5, atol=1e-6), (loss, ref)

    # Unweighted (compile-time specialized) path.
    loss_nw = joints_ohkm_mse_loss(output, target, None,
                                   use_target_weight=False, topk=topk)
    ref_nw = _reference(output, target, target_weight, False, topk)
    assert jnp.allclose(jax.block_until_ready(loss_nw), ref_nw,
                        rtol=1e-5, atol=1e-6), (loss_nw, ref_nw)

    # Zero-weight tie fixture: fewer nonzero joints than topk, so exact 0.0 ties
    # sit on the top-k boundary (validates the single-reduction top-k shortcut).
    tw_sparse = target_weight.at[:, 6:, :].set(0.0)
    loss_sp = joints_ohkm_mse_loss(output, target, tw_sparse,
                                   use_target_weight=True, topk=topk)
    ref_sp = _reference(output, target, tw_sparse, True, topk)
    assert jnp.allclose(jax.block_until_ready(loss_sp), ref_sp,
                        rtol=1e-5, atol=1e-6), (loss_sp, ref_sp)

    print("KERNEL_OK")
</pallas_src>

<mosaic_0001>
module attributes {stable_mosaic.version = 11 : i64} {
  func.func @_ohkm_kernel_w(%arg0: memref<4x16xf32, #tpu.memory_space<vmem>>, %arg1: memref<4x16x256xf32, #tpu.memory_space<vmem>>, %arg2: memref<4x16x256xf32, #tpu.memory_space<vmem>>, %arg3: memref<1x1xf32, #tpu.memory_space<vmem>>) attributes {dimension_semantics = [], scalar_prefetch = 0 : i64, scratch_operands = 0 : i64, tpu.core_type = #tpu.core_type<tc>} {
    %c0 = arith.constant 0 : index
    %c0_0 = arith.constant 0 : index
    %c0_1 = arith.constant 0 : index
    %0 = vector.load %arg1[%c0, %c0_0, %c0_1] : memref<4x16x256xf32, #tpu.memory_space<vmem>>, vector<4x16x256xf32>
    %c0_2 = arith.constant 0 : index
    %c0_3 = arith.constant 0 : index
    %c0_4 = arith.constant 0 : index
    %1 = vector.load %arg2[%c0_2, %c0_3, %c0_4] : memref<4x16x256xf32, #tpu.memory_space<vmem>>, vector<4x16x256xf32>
    %2 = arith.subf %0, %1 : vector<4x16x256xf32>
    %3 = arith.mulf %2, %2 : vector<4x16x256xf32>
    %cst = arith.constant dense<0.000000e+00> : vector<4x16xf32>
    %4 = vector.multi_reduction <add>, %3, %cst [2] : vector<4x16x256xf32> to vector<4x16xf32>
    %c0_5 = arith.constant 0 : index
    %c0_6 = arith.constant 0 : index
    %5 = vector.load %arg0[%c0_5, %c0_6] : memref<4x16xf32, #tpu.memory_space<vmem>>, vector<4x16xf32>
    %6 = arith.mulf %5, %5 : vector<4x16xf32>
    %cst_7 = arith.constant 0.001953125 : f32
    %7 = vector.broadcast %cst_7 : f32 to vector<4x16xf32>
    %8 = arith.mulf %6, %7 : vector<4x16xf32>
    %9 = arith.mulf %4, %8 : vector<4x16xf32>
    %cst_8 = arith.constant 0.000000e+00 : f32
    %10 = vector.broadcast %cst_8 : f32 to vector<4x1xf32>
    %cst_9 = arith.constant dense<0xFF800000> : vector<4xf32>
    %11 = vector.multi_reduction <maximumf>, %9, %cst_9 [1] : vector<4x16xf32> to vector<4xf32>
    %12 = vector.shape_cast %11 : vector<4xf32> to vector<4x1xf32>
    %13 = arith.addf %10, %12 : vector<4x1xf32>
    %14 = vector.broadcast %12 : vector<4x1xf32> to vector<4x16xf32>
    %15 = arith.cmpf oeq, %9, %14 : vector<4x16xf32>
    %cst_10 = arith.constant 0.000000e+00 : f32
    %16 = vector.broadcast %cst_10 : f32 to vector<4x16xf32>
    %17 = arith.select %15, %16, %9 : vector<4x16xi1>, vector<4x16xf32>
    %cst_11 = arith.constant dense<0xFF800000> : vector<4xf32>
    %18 = vector.multi_reduction <maximumf>, %17, %cst_11 [1] : vector<4x16xf32> to vector<4xf32>
    %19 = vector.shape_cast %18 : vector<4xf32> to vector<4x1xf32>
    %20 = arith.addf %13, %19 : vector<4x1xf32>
    %21 = vector.broadcast %19 : vector<4x1xf32> to vector<4x16xf32>
    %22 = arith.cmpf oeq, %17, %21 : vector<4x16xf32>
    %cst_12 = arith.constant 0.000000e+00 : f32
    %23 = vector.broadcast %cst_12 : f32 to vector<4x16xf32>
    %24 = arith.select %22, %23, %17 : vector<4x16xi1>, vector<4x16xf32>
    %cst_13 = arith.constant dense<0xFF800000> : vector<4xf32>
    %25 = vector.multi_reduction <maximumf>, %24, %cst_13 [1] : vector<4x16xf32> to vector<4xf32>
    %26 = vector.shape_cast %25 : vector<4xf32> to vector<4x1xf32>
    %27 = arith.addf %20, %26 : vector<4x1xf32>
    %28 = vector.broadcast %26 : vector<4x1xf32> to vector<4x16xf32>
    %29 = arith.cmpf oeq, %24, %28 : vector<4x16xf32>
    %cst_14 = arith.constant 0.000000e+00 : f32
    %30 = vector.broadcast %cst_14 : f32 to vector<4x16xf32>
    %31 = arith.select %29, %30, %24 : vector<4x16xi1>, vector<4x16xf32>
    %cst_15 = arith.constant dense<0xFF800000> : vector<4xf32>
    %32 = vector.multi_reduction <maximumf>, %31, %cst_15 [1] : vector<4x16xf32> to vector<4xf32>
    %33 = vector.shape_cast %32 : vector<4xf32> to vector<4x1xf32>
    %34 = arith.addf %27, %33 : vector<4x1xf32>
    %35 = vector.broadcast %33 : vector<4x1xf32> to vector<4x16xf32>
    %36 = arith.cmpf oeq, %31, %35 : vector<4x16xf32>
    %cst_16 = arith.constant 0.000000e+00 : f32
    %37 = vector.broadcast %cst_16 : f32 to vector<4x16xf32>
    %38 = arith.select %36, %37, %31 : vector<4x16xi1>, vector<4x16xf32>
    %cst_17 = arith.constant dense<0xFF800000> : vector<4xf32>
    %39 = vector.multi_reduction <maximumf>, %38, %cst_17 [1] : vector<4x16xf32> to vector<4xf32>
    %40 = vector.shape_cast %39 : vector<4xf32> to vector<4x1xf32>
    %41 = arith.addf %34, %40 : vector<4x1xf32>
    %42 = vector.broadcast %40 : vector<4x1xf32> to vector<4x16xf32>
    %43 = arith.cmpf oeq, %38, %42 : vector<4x16xf32>
    %cst_18 = arith.constant 0.000000e+00 : f32
    %44 = vector.broadcast %cst_18 : f32 to vector<4x16xf32>
    %45 = arith.select %43, %44, %38 : vector<4x16xi1>, vector<4x16xf32>
    %cst_19 = arith.constant dense<0xFF800000> : vector<4xf32>
    %46 = vector.multi_reduction <maximumf>, %45, %cst_19 [1] : vector<4x16xf32> to vector<4xf32>
    %47 = vector.shape_cast %46 : vector<4xf32> to vector<4x1xf32>
    %48 = arith.addf %41, %47 : vector<4x1xf32>
    %49 = vector.broadcast %47 : vector<4x1xf32> to vector<4x16xf32>
    %50 = arith.cmpf oeq, %45, %49 : vector<4x16xf32>
    %cst_20 = arith.constant 0.000000e+00 : f32
    %51 = vector.broadcast %cst_20 : f32 to vector<4x16xf32>
    %52 = arith.select %50, %51, %45 : vector<4x16xi1>, vector<4x16xf32>
    %cst_21 = arith.constant dense<0xFF800000> : vector<4xf32>
    %53 = vector.multi_reduction <maximumf>, %52, %cst_21 [1] : vector<4x16xf32> to vector<4xf32>
    %54 = vector.shape_cast %53 : vector<4xf32> to vector<4x1xf32>
    %55 = arith.addf %48, %54 : vector<4x1xf32>
    %56 = vector.broadcast %54 : vector<4x1xf32> to vector<4x16xf32>
    %57 = arith.cmpf oeq, %52, %56 : vector<4x16xf32>
    %cst_22 = arith.constant 0.000000e+00 : f32
    %58 = vector.broadcast %cst_22 : f32 to vector<4x16xf32>
    %59 = arith.select %57, %58, %52 : vector<4x16xi1>, vector<4x16xf32>
    %cst_23 = arith.constant dense<0xFF800000> : vector<4xf32>
    %60 = vector.multi_reduction <maximumf>, %59, %cst_23 [1] : vector<4x16xf32> to vector<4xf32>
    %61 = vector.shape_cast %60 : vector<4xf32> to vector<4x1xf32>
    %62 = arith.addf %55, %61 : vector<4x1xf32>
    %cst_24 = arith.constant dense<0.000000e+00> : vector<1xf32>
    %63 = vector.multi_reduction <add>, %62, %cst_24 [0] : vector<4x1xf32> to vector<1xf32>
    %64 = vector.shape_cast %63 : vector<1xf32> to vector<1x1xf32>
    %cst_25 = arith.constant 3.125000e-02 : f32
    %65 = vector.broadcast %cst_25 : f32 to vector<1x1xf32>
    %66 = arith.mulf %64, %65 : vector<1x1xf32>
    %c0_26 = arith.constant 0 : index
    %c0_27 = arith.constant 0 : index
    %67 = vector.load %arg3[%c0_26, %c0_27] : memref<1x1xf32, #tpu.memory_space<vmem>>, vector<1x1xf32>
    tpu.vector_store %arg3[%c0_26, %c0_27], %66 {strides = array<i32>} : memref<1x1xf32, #tpu.memory_space<vmem>>, vector<1x1xf32>,
    return
  }
}

</mosaic_0001>

<bundles_post_ra>
// kernel: tpu_custom_call.1
= control target key start
LH: loop header
LB: loop body
LE: loop exit
PB: predicated region body
PF: predicated region fallthrough
CT: control target
= control target key end

     0   :  { %8 = vsyncpa [#allocation3], 0  ;;  %s1489_s0 = inlined_call_operand.hbm [shape: f32[4,16], index: 0, kind: input, shape index: {}]   ;;  %s1490_s1 = inlined_call_operand.hbm [shape: f32[4,16,256], index: 1, kind: input, shape index: {}]   ;;  %s1491_s2 = inlined_call_operand.hbm [shape: f32[4,16,256], index: 2, kind: input, shape index: {}]   ;;  %s1492_s3 = inlined_call_operand.hbm [shape: f32[1,1], index: 3, kind: output, shape index: {}]  }
   0x1   :  { %9 = vsyncpa [#allocation6], 0 }
   0x2   :  { %10 = vsyncpa [#allocation4], 0  ;;  %s1203_s12 = smov [#allocation5]  }
   0x3   :  { %s26_s13 = sshll.u32 %s1203_s12, 4  ;;  %s27_s13 = int_to_ptr.vmem [resolvable:$true] %s26_s13 }
   0x4   :  { %s1125_s14 = scalar_lea.vmem %s27_s13, 2048  ;;  %p1130_p1 = scmp.lt.s32.totalorder %s27_s13, %s27_s13 }
   0x5   :  { %p1126_p0 = scmp.ne.s32.totalorder %s27_s13, %s1125_s14  ;;  %p1131_p2 = scmp.lt.s32.totalorder %s1125_s14, %s1125_s14 }
   0x7   :  { %p1132_p3 = por %p1131_p2, %p1130_p1 }
   0x9   :  { %p1133_p4 = pnand %p1132_p3, %p1126_p0 }
   0xb   :  { %1136 = shalt.err (!%p1133_p4)
}
   0xc   :  { %s1204_s15 = smov 256   ;;  %s1205_s16 = smov 16  }
   0xd   :  { %32 = dma.hbm_to_vmem [thread:$0]  %s1490_s1, 2048, %s27_s13, [#allocation6], %s1204_s15, %s1204_s15, %s1205_s16  }
   0xe   :  { %s1206_s19 = smov [#allocation2]   ;;  %s1207_s21 = smov [#allocation7]  }
   0xf   :  { %s17_s20 = sshll.u32 %s1206_s19, 4  ;;  %s38_s22 = sshll.u32 %s1207_s21, 4  ;;  %s18_s20 = int_to_ptr.vmem [resolvable:$true] %s17_s20  ;;  %s39_s22 = int_to_ptr.vmem [resolvable:$true] %s38_s22 }
  0x10   :  { %s1145_s23 = scalar_lea.vmem %s18_s20, 64  ;;  %p1150_p6 = scmp.lt.s32.totalorder %s18_s20, %s18_s20 }
  0x11   :  { %p1146_p5 = scmp.ne.s32.totalorder %s18_s20, %s1145_s23  ;;  %p1151_p7 = scmp.lt.s32.totalorder %s1145_s23, %s1145_s23 }
  0x13   :  { %p1152_p8 = por %p1151_p7, %p1150_p6 }
  0x15   :  { %p1153_p9 = pnand %p1152_p8, %p1146_p5 }
  0x17   :  { %1156 = shalt.err (!%p1153_p9)
}
  0x18   :  { %20 = dma.hbm_to_vmem [thread:$0]  %s1489_s0, 64, %s18_s20, [#allocation3]  }
  0x19   :  { %s1165_s26 = scalar_lea.vmem %s39_s22, 2048  ;;  %p1170_p11 = scmp.lt.s32.totalorder %s39_s22, %s39_s22 }
  0x1a   :  { %p1166_p10 = scmp.ne.s32.totalorder %s39_s22, %s1165_s26  ;;  %p1171_p12 = scmp.lt.s32.totalorder %s1165_s26, %s1165_s26 }
  0x1c   :  { %p1172_p13 = por %p1171_p12, %p1170_p11 }
  0x1e   :  { %p1173_p0 = pnand %p1172_p13, %p1166_p10 }
  0x20   :  { %1176 = shalt.err (!%p1173_p0)
}
  0x21   :  { %44 = dma.hbm_to_vmem [thread:$0]  %s1491_s2, 2048, %s39_s22, [#allocation6], %s1204_s15, %s1204_s15, %s1205_s16  }
  0x22   :  { %1197 = dma.done.wait [#allocation3], 64  }
  0x23   :  { %1198 = vsyncadd [#allocation3], 4294967232 }
  0x24   :  { %1199 = dma.done.wait [#allocation6], 4096  }
  0x25   :  { %1200 = vsyncadd [#allocation6], 4294963200  ;;  %v146_v0 = vlaneseq  ;;  %v58_v6 = vld [vmem:[#allocation5 + $0x20] sm:$0xff]  ;;  %v59_v7 = vld [vmem:[#allocation5 + $0x28] sm:$0xff]  ;;  %vm249_vm0 = vcmask 130112   ;;  %vm278_vm1 = vcmask 1041409  }
  0x26   :  { %v74_v8 = vld [vmem:[#allocation7 + $0x20] sm:$0xff]  ;;  %v75_v9 = vld [vmem:[#allocation7 + $0x28] sm:$0xff]  ;;  %v60_v16 = vld [vmem:[#allocation5 + $0x30] sm:$0xff]  ;;  %vm280_vm2 = vcmask 1042434   ;;  %vm282_vm3 = vcmask 1043459   ;;  %vm285_vm4 = vcmask 125952  }
  0x27   :  { %v1239_v1 = vshrl.u32 %v146_v0, 7  ;;  %v239_v2 = vand.u32 127, %v146_v0  ;;  %v90_v10 = vsub.f32 %v58_v6, %v74_v8  ;;  %v54_v11 = vld [vmem:[#allocation5] sm:$0xff]  ;;  %v55_v12 = vld [vmem:[#allocation5 + $0x8] sm:$0xff]  ;;  %v91_v13 = vsub.f32 %v59_v7, %v75_v9  ;;  %v61_v20 = vld [vmem:[#allocation5 + $0x38] sm:$0xff]  ;;  %s1209_s0 = smov [#allocation8]  }
  0x28   :  { %v70_v14 = vld [vmem:[#allocation7] sm:$0xff]  ;;  %v71_v15 = vld [vmem:[#allocation7 + $0x8] sm:$0xff]  ;;  %v76_v21 = vld [vmem:[#allocation7 + $0x30] sm:$0xff]  ;;  %s1098_s2 = sshll.u32 %s1209_s0, 4  ;;  %s1099_s2 = int_to_ptr.vmem [resolvable:$true] %s1098_s2 }
  0x29   :  { %v1242_v3 = vsub.s32 %v239_v2, %v1239_v1  ;;  %v244_v4 = vadd.s32 4294967288, %v239_v2  ;;  %v106_v17 = vmul.f32 %v90_v10, %v90_v10  ;;  %v86_v18 = vsub.f32 %v54_v11, %v70_v14  ;;  %v77_v22 = vld [vmem:[#allocation7 + $0x38] sm:$0xff]  ;;  %v56_v26 = vld [vmem:[#allocation5 + $0x10] sm:$0xff]  ;;  %v62_v41 = vld [vmem:[#allocation5 + $0x40] sm:$0xff]  ;;  %s1177_s28 = scalar_lea.vmem %s1099_s2, 16  ;;  %s1181_s29 = scalar_lea.vmem %s1099_s2, 32 }
  0x2a   :  { %v87_v19 = vsub.f32 %v55_v12, %v71_v15  ;;  %v107_v23 = vmul.f32 %v91_v13, %v91_v13  ;;  %v92_v24 = vsub.f32 %v60_v16, %v76_v21  ;;  %v93_v25 = vsub.f32 %v61_v20, %v77_v22  ;;  %v57_v27 = vld [vmem:[#allocation5 + $0x18] sm:$0xff]  ;;  %v72_v28 = vld [vmem:[#allocation7 + $0x10] sm:$0xff]  ;;  %v63_v46 = vld [vmem:[#allocation5 + $0x48] sm:$0xff]  ;;  %p1178_p1 = scmp.ne.s32.totalorder %s1099_s2, %s1177_s28  ;;  %p1182_p2 = scmp.lt.s32.totalorder %s1099_s2, %s1099_s2 }
  0x2b   :  { %v1245_v5 = vsub.s32 %v244_v4, %v1239_v1  ;;  %v102_v29 = vmul.f32 %v86_v18, %v86_v18  ;;  %v73_v31 = vld [vmem:[#allocation7 + $0x18] sm:$0xff]  ;;  %v88_v32 = vsub.f32 %v56_v26, %v72_v28  ;;  %v64_v33 = vld [vmem:[#allocation5 + $0x50] sm:$0xff]  ;;  %v78_v47 = vld [vmem:[#allocation7 + $0x40] sm:$0xff]  ;;  %v1248_v20 = vsub.s32 0, %v1239_v1  ;;  %p1183_p3 = scmp.lt.s32.totalorder %s1181_s29, %s1177_s28 }
  0x2c   :  { %v103_v30 = vmul.f32 %v87_v19, %v87_v19  ;;  %v65_v34 = vld [vmem:[#allocation5 + $0x58] sm:$0xff]  ;;  %v124_v35 = vadd.f32 %v107_v23, %v106_v17  ;;  %v108_v36 = vmul.f32 %v92_v24, %v92_v24  ;;  %v109_v37 = vmul.f32 %v93_v25, %v93_v25  ;;  %v80_v39 = vld [vmem:[#allocation7 + $0x50] sm:$0xff]  ;;  %v79_v48 = vld [vmem:[#allocation7 + $0x48] sm:$0xff] }
  0x2d   :  { %v89_v38 = vsub.f32 %v57_v27, %v73_v31  ;;  %v81_v40 = vld [vmem:[#allocation7 + $0x58] sm:$0xff]  ;;  %v104_v43 = vmul.f32 %v88_v32, %v88_v32  ;;  %v96_v44 = vsub.f32 %v64_v33, %v80_v39  ;;  %v94_v51 = vsub.f32 %v62_v41, %v78_v47  ;;  %v68_v53 = vld [vmem:[#allocation5 + $0x70] sm:$0xff]  ;;  %v66_v60 = vld [vmem:[#allocation5 + $0x60] sm:$0xff]  ;;  %p1184_p4 = por %p1183_p3, %p1182_p2 }
  0x2e   :  { %v118_v42 = vadd.f32 %v103_v30, %v102_v29  ;;  %v97_v45 = vsub.f32 %v65_v34, %v81_v40  ;;  %125 = vadd.xlane.f32.xlu1 %v124_v35  ;;  %v127_v49 = vadd.f32 %v109_v37, %v108_v36  ;;  %v95_v52 = vsub.f32 %v63_v46, %v79_v48  ;;  %v69_v54 = vld [vmem:[#allocation5 + $0x78] sm:$0xff]  ;;  %v84_v55 = vld [vmem:[#allocation7 + $0x70] sm:$0xff]  ;;  %v67_v61 = vld [vmem:[#allocation5 + $0x68] sm:$0xff] }
  0x2f   :  { %v105_v50 = vmul.f32 %v89_v38, %v89_v38  ;;  %v112_v56 = vmul.f32 %v96_v44, %v96_v44  ;;  %v85_v58 = vld [vmem:[#allocation7 + $0x78] sm:$0xff]  ;;  %v100_v59 = vsub.f32 %v68_v53, %v84_v55  ;;  %v110_v63 = vmul.f32 %v94_v51, %v94_v51  ;;  %v82_v4 = vld [vmem:[#allocation7 + $0x60] sm:$0xff]  ;;  %v83_v6 = vld [vmem:[#allocation7 + $0x68] sm:$0xff]  ;;  %p1185_p5 = pnand %p1184_p4, %p1178_p1 }
  0x30   :  { %119 = vadd.xlane.f32.xlu0 %v118_v42  ;;  %v113_v57 = vmul.f32 %v97_v45, %v97_v45  ;;  %v111_v0 = vmul.f32 %v95_v52, %v95_v52  ;;  %v101_v2 = vsub.f32 %v69_v54, %v85_v58  ;;  %v98_v7 = vsub.f32 %v66_v60, %v82_v4  ;;  %v142_v17 = vld [vmem:[#allocation2] sm:$0xf] }
  0x31   :  { %v121_v62 = vadd.f32 %v105_v50, %v104_v43  ;;  %v99_v8 = vsub.f32 %v67_v61, %v83_v6  ;;  %v116_v10 = vmul.f32 %v100_v59, %v100_v59  ;;  %v143_v18 = vmul.f32 %v142_v17, %v142_v17 }
  0x32   :  { %128 = vadd.xlane.f32.xlu1 %v127_v49  ;;  %v133_v9 = vadd.f32 %v113_v57, %v112_v56  ;;  %v117_v11 = vmul.f32 %v101_v2, %v101_v2  ;;  %v130_v12 = vadd.f32 %v111_v0, %v110_v63  ;;  %v114_v13 = vmul.f32 %v98_v7, %v98_v7 }
  0x33   :  { %v115_v14 = vmul.f32 %v99_v8, %v99_v8  ;;  %v144_v19 = vmul.f32 0.001953125, %v143_v18  ;;  %v1252_v22 = vsub.s32 1, %v1239_v1  ;;  %v1208_v23 = vmov 0  }
  0x34   :  { %122 = vadd.xlane.f32.xlu0 %v121_v62  ;;  %v139_v15 = vadd.f32 %v117_v11, %v116_v10  ;;  %1116 = vset.pattern.permute.xlu1 %v1208_v23  ;;  %v1256_v25 = vsub.s32 2, %v1239_v1  ;;  %v1260_v27 = vsub.s32 3, %v1239_v1 }
  0x35   :  { %v136_v16 = vadd.f32 %v115_v14, %v114_v13  ;;  %v149_v21 = vrot.slane %v144_v19, %v1248_v20  ;;  %1115 = vset.pattern.permute.xlu0 %v1208_v23  ;;  %v160_v24 = vrot.slane %v144_v19, %v1252_v22 }
  0x36   :  { %134 = vadd.xlane.f32.xlu1 %v133_v9  ;;  %v171_v26 = vrot.slane %v144_v19, %v1256_v25  ;;  %v182_v28 = vrot.slane %v144_v19, %v1260_v27 }
  0x38   :  { %131 = vadd.xlane.f32.xlu0 %v130_v12 }
  0x3a   :  { %140 = vadd.xlane.f32.xlu1 %v139_v15 }
  0x3c   :  { %137 = vadd.xlane.f32.xlu0 %v136_v16 }
  0x4b   :  { %155 = vbcast.lane.b32.xlu1 %v149_v21, 264 }
  0x4f   :  { %162 = vbcast.lane.b32.xlu1 %v160_v24, 256 }
  0x52   :  { %151 = vbcast.lane.b32.xlu0 %v149_v21, 256 }
  0x53   :  { %166 = vbcast.lane.b32.xlu1 %v160_v24, 264 }
  0x56   :  { %173 = vbcast.lane.b32.xlu0 %v171_v26, 256 }
  0x57   :  { %177 = vbcast.lane.b32.xlu1 %v171_v26, 264 }
  0x5a   :  { %184 = vbcast.lane.b32.xlu0 %v182_v28, 256 }
  0x5b   :  { %188 = vbcast.lane.b32.xlu1 %v182_v28, 264 }
  0xb7   :  { %v126_v29 = vpop.xlane.xlu1 %125 }
  0xb9   :  { %v120_v30 = vpop.xlane.xlu0 %119 }
  0xbb   :  { %v129_v31 = vpop.xlane.xlu1 %128 }
  0xbd   :  { %v123_v32 = vpop.xlane.xlu0 %122 }
  0xbf   :  { %v135_v33 = vpop.xlane.xlu1 %134 }
  0xc1   :  { %v132_v34 = vpop.xlane.xlu0 %131 }
  0xc3   :  { %v141_v35 = vpop.xlane.xlu1 %140 }
  0xc5   :  { %v138_v36 = vpop.xlane.xlu0 %137 }
  0xc7   :  { %v156_v37 = vpop.permute.xlu1 %155 }
  0xc8   :  { %v199_v38 = vmul.f32 %v156_v37, %v123_v32 }
  0xc9   :  { %v152_v39 = vpop.permute.xlu0 %151 }
  0xca   :  { %v198_v1 = vmul.f32 %v152_v39, %v120_v30  ;;  %218 = vperm.xlu1 %1116, %v199_v38  }
  0xcb   :  { %v163_v40 = vpop.permute.xlu1 %162 }
  0xcc   :  { %215 = vperm.xlu0 %1115, %v198_v1   ;;  %v200_v41 = vmul.f32 %v163_v40, %v126_v29 }
  0xcd   :  { %v174_v42 = vpop.permute.xlu0 %173 }
  0xce   :  { %221 = vperm.xlu1 %1116, %v200_v41   ;;  %v202_v44 = vmul.f32 %v174_v42, %v132_v34 }
  0xcf   :  { %v167_v43 = vpop.permute.xlu1 %166 }
  0xd0   :  { %v201_v45 = vmul.f32 %v167_v43, %v129_v31 }
  0xd1   :  { %v185_v46 = vpop.permute.xlu0 %184 }
  0xd2   :  { %224 = vperm.xlu0 %1115, %v201_v45   ;;  %227 = vperm.xlu1 %1116, %v202_v44   ;;  %v204_v48 = vmul.f32 %v185_v46, %v138_v36 }
  0xd3   :  { %v178_v47 = vpop.permute.xlu1 %177 }
  0xd4   :  { %v203_v49 = vmul.f32 %v178_v47, %v135_v33 }
  0xd6   :  { %230 = vperm.xlu0 %1115, %v203_v49   ;;  %233 = vperm.xlu1 %1116, %v204_v48  }
  0xd7   :  { %v189_v50 = vpop.permute.xlu1 %188 }
  0xd8   :  { %v205_v51 = vmul.f32 %v189_v50, %v141_v35 }
  0xda   :  { %236 = vperm.xlu0 %1115, %v205_v51  }
 0x145   :  { %v219_v52 = vpop.permute.xlu1 %218 }
 0x146   :  { %v248_v59 = vrot.slane %v219_v52, %v1245_v5 }
 0x147   :  { %v216_v53 = vpop.permute.xlu0 %215 }
 0x148   :  { %v243_v60 = vrot.slane %v216_v53, %v1242_v3 }
 0x149   :  { %v222_v54 = vpop.permute.xlu1 %221 }
 0x14a   :  { %v254_v61 = vrot.slane %v222_v54, %v1242_v3  ;;  %v250_v7 = vsel %vm249_vm0, %v248_v59, %v243_v60 }
 0x14d   :  { %v228_v55 = vpop.permute.xlu1 %227  ;;  %v225_v56 = vpop.permute.xlu0 %224 }
 0x14e   :  { %v258_v57 = vrot.slane %v225_v56, %v1245_v5  ;;  %v263_v63 = vrot.slane %v228_v55, %v1242_v3 }
 0x150   :  { %v259_v2 = vsel %vm249_vm0, %v258_v57, %v254_v61 }
 0x151   :  { %v231_v58 = vpop.permute.xlu0 %230  ;;  %v234_v0 = vpop.permute.xlu1 %233  ;;  %v279_v10 = vsel %vm278_vm1, %v259_v2, %v250_v7 }
 0x152   :  { %v267_v62 = vrot.slane %v231_v58, %v1245_v5  ;;  %v272_v8 = vrot.slane %v234_v0, %v1242_v3 }
 0x154   :  { %v268_v4 = vsel %vm249_vm0, %v267_v62, %v263_v63 }
 0x155   :  { %v237_v6 = vpop.permute.xlu0 %236  ;;  %v281_v12 = vsel %vm280_vm2, %v268_v4, %v279_v10 }
 0x156   :  { %v276_v9 = vrot.slane %v237_v6, %v1245_v5 }
 0x158   :  { %v277_v11 = vsel %vm249_vm0, %v276_v9, %v272_v8 }
 0x159   :  { %v283_v13 = vsel %vm282_vm3, %v277_v11, %v281_v12 }
 0x15a   :  { %v286_v14 = vsel %vm285_vm4, %v283_v13, -inf }
 0x15b   :  { %287 = vmax.xlane.f32.xlu1 %v286_v14 }
 0x1e4   :  { %v1279_v15 = vpop.xlane.xlu1 %287 }
 0x1e5   :  { %v294_v16 = vrot.slane %v1279_v15, %v1248_v20  ;;  %v298_v18 = vrot.slane %v1279_v15, %v1252_v22  ;;  %v302_v23 = vrot.slane %v1279_v15, %v1256_v25  ;;  %v306_v28 = vrot.slane %v1279_v15, %v1260_v27 }
 0x1e7   :  { %vm311_vm5 = vcmp.eq.f32.partialorder %v198_v1, %v294_v16  ;;  %vm312_vm6 = vcmp.eq.f32.partialorder %v199_v38, %v294_v16  ;;  %vm313_vm7 = vcmp.eq.f32.partialorder %v200_v41, %v298_v18  ;;  %vm314_vm8 = vcmp.eq.f32.partialorder %v201_v45, %v298_v18 }
 0x1e8   :  { %v319_v17 = vsel %vm311_vm5, 0.0, %v198_v1  ;;  %v320_v19 = vsel %vm312_vm6, 0.0, %v199_v38  ;;  %v321_v21 = vsel %vm313_vm7, 0.0, %v200_v41  ;;  %v322_v24 = vsel %vm314_vm8, 0.0, %v201_v45 }
 0x1e9   :  { %336 = vperm.xlu0 %1115, %v319_v17   ;;  %vm315_vm9 = vcmp.eq.f32.partialorder %v202_v44, %v302_v23  ;;  %vm316_vm10 = vcmp.eq.f32.partialorder %v203_v49, %v302_v23  ;;  %vm317_vm11 = vcmp.eq.f32.partialorder %v204_v48, %v306_v28  ;;  %vm318_vm12 = vcmp.eq.f32.partialorder %v205_v51, %v306_v28 }
 0x1ea   :  { %v323_v26 = vsel %vm315_vm9, 0.0, %v202_v44  ;;  %v324_v29 = vsel %vm316_vm10, 0.0, %v203_v49  ;;  %v325_v30 = vsel %vm317_vm11, 0.0, %v204_v48  ;;  %v326_v31 = vsel %vm318_vm12, 0.0, %v205_v51 }
 0x1ed   :  { %339 = vperm.xlu0 %1115, %v320_v19  }
 0x1f1   :  { %342 = vperm.xlu0 %1115, %v321_v21  }
 0x1f5   :  { %345 = vperm.xlu0 %1115, %v322_v24  }
 0x1f9   :  { %348 = vperm.xlu0 %1115, %v323_v26  }
 0x1fd   :  { %351 = vperm.xlu0 %1115, %v324_v29  }
 0x201   :  { %354 = vperm.xlu0 %1115, %v325_v30  }
 0x205   :  { %357 = vperm.xlu0 %1115, %v326_v31  }
 0x264   :  { %v337_v32 = vpop.permute.xlu0 %336 }
 0x265   :  { %v362_v43 = vrot.slane %v337_v32, %v1242_v3 }
 0x268   :  { %v340_v33 = vpop.permute.xlu0 %339 }
 0x269   :  { %v366_v40 = vrot.slane %v340_v33, %v1245_v5 }
 0x26b   :  { %v367_v47 = vsel %vm249_vm0, %v366_v40, %v362_v43 }
 0x26c   :  { %v343_v34 = vpop.permute.xlu0 %342 }
 0x26d   :  { %v371_v41 = vrot.slane %v343_v34, %v1242_v3 }
 0x270   :  { %v346_v35 = vpop.permute.xlu0 %345 }
 0x271   :  { %v375_v38 = vrot.slane %v346_v35, %v1245_v5 }
 0x273   :  { %v376_v44 = vsel %vm249_vm0, %v375_v38, %v371_v41 }
 0x274   :  { %v349_v36 = vpop.permute.xlu0 %348  ;;  %v395_v50 = vsel %vm278_vm1, %v376_v44, %v367_v47 }
 0x275   :  { %v380_v42 = vrot.slane %v349_v36, %v1242_v3 }
 0x278   :  { %v352_v37 = vpop.permute.xlu0 %351 }
 0x279   :  { %v384_v39 = vrot.slane %v352_v37, %v1245_v5 }
 0x27b   :  { %v385_v45 = vsel %vm249_vm0, %v384_v39, %v380_v42 }
 0x27c   :  { %v355_v1 = vpop.permute.xlu0 %354  ;;  %v396_v52 = vsel %vm280_vm2, %v385_v45, %v395_v50 }
 0x27d   :  { %v389_v48 = vrot.slane %v355_v1, %v1242_v3 }
 0x280   :  { %v358_v46 = vpop.permute.xlu0 %357 }
 0x281   :  { %v393_v49 = vrot.slane %v358_v46, %v1245_v5 }
 0x283   :  { %v394_v51 = vsel %vm249_vm0, %v393_v49, %v389_v48 }
 0x284   :  { %v397_v53 = vsel %vm282_vm3, %v394_v51, %v396_v52 }
 0x285   :  { %v399_v54 = vsel %vm285_vm4, %v397_v53, -inf }
 0x286   :  { %400 = vmax.xlane.f32.xlu0 %v399_v54 }
 0x30f   :  { %v1305_v55 = vpop.xlane.xlu0 %400 }
 0x310   :  { %v415_v56 = vrot.slane %v1305_v55, %v1256_v25  ;;  %v407_v57 = vrot.slane %v1305_v55, %v1248_v20  ;;  %v411_v60 = vrot.slane %v1305_v55, %v1252_v22  ;;  %v419_v0 = vrot.slane %v1305_v55, %v1260_v27 }
 0x312   :  { %vm428_vm13 = vcmp.eq.f32.partialorder %v323_v26, %v415_v56  ;;  %vm424_vm14 = vcmp.eq.f32.partialorder %v319_v17, %v407_v57  ;;  %vm425_vm15 = vcmp.eq.f32.partialorder %v320_v19, %v407_v57  ;;  %vm426_vm5 = vcmp.eq.f32.partialorder %v321_v21, %v411_v60 }
 0x313   :  { %v1311_v58 = vsel %vm428_vm13, 0.0, %v323_v26  ;;  %v432_v59 = vsel %vm424_vm14, 0.0, %v319_v17  ;;  %v433_v61 = vsel %vm425_vm15, 0.0, %v320_v19  ;;  %v434_v62 = vsel %vm426_vm5, 0.0, %v321_v21 }
 0x314   :  { %461 = vperm.xlu0 %1115, %v1311_v58   ;;  %449 = vperm.xlu1 %1116, %v432_v59   ;;  %vm427_vm6 = vcmp.eq.f32.partialorder %v322_v24, %v411_v60  ;;  %vm429_vm7 = vcmp.eq.f32.partialorder %v324_v29, %v415_v56  ;;  %vm430_vm8 = vcmp.eq.f32.partialorder %v325_v30, %v419_v0 }
 0x315   :  { %v435_v63 = vsel %vm427_vm6, 0.0, %v322_v24  ;;  %v437_v2 = vsel %vm429_vm7, 0.0, %v324_v29  ;;  %v438_v4 = vsel %vm430_vm8, 0.0, %v325_v30  ;;  %vm431_vm9 = vcmp.eq.f32.partialorder %v326_v31, %v419_v0 }
 0x316   :  { %v439_v6 = vsel %vm431_vm9, 0.0, %v326_v31 }
 0x318   :  { %452 = vperm.xlu1 %1116, %v433_v61  }
 0x31c   :  { %455 = vperm.xlu1 %1116, %v434_v62  }
 0x320   :  { %458 = vperm.xlu1 %1116, %v435_v63  }
 0x324   :  { %464 = vperm.xlu1 %1116, %v437_v2  }
 0x328   :  { %467 = vperm.xlu1 %1116, %v438_v4  }
 0x32c   :  { %470 = vperm.xlu1 %1116, %v439_v6  }
 0x38f   :  { %v450_v7 = vpop.permute.xlu1 %449  ;;  %v462_v12 = vpop.permute.xlu0 %461 }
 0x390   :  { %v493_v19 = vrot.slane %v462_v12, %v1242_v3  ;;  %v475_v21 = vrot.slane %v450_v7, %v1242_v3 }
 0x393   :  { %v453_v8 = vpop.permute.xlu1 %452 }
 0x394   :  { %v479_v17 = vrot.slane %v453_v8, %v1245_v5 }
 0x396   :  { %v480_v28 = vsel %vm249_vm0, %v479_v17, %v475_v21 }
 0x397   :  { %v456_v9 = vpop.permute.xlu1 %455 }
 0x398   :  { %v484_v18 = vrot.slane %v456_v9, %v1242_v3 }
 0x39b   :  { %v459_v10 = vpop.permute.xlu1 %458 }
 0x39c   :  { %v488_v13 = vrot.slane %v459_v10, %v1245_v5 }
 0x39e   :  { %v489_v23 = vsel %vm249_vm0, %v488_v13, %v484_v18 }
 0x39f   :  { %v465_v11 = vpop.permute.xlu1 %464  ;;  %v508_v31 = vsel %vm278_vm1, %v489_v23, %v480_v28 }
 0x3a0   :  { %v497_v14 = vrot.slane %v465_v11, %v1245_v5 }
 0x3a2   :  { %v498_v24 = vsel %vm249_vm0, %v497_v14, %v493_v19 }
 0x3a3   :  { %v468_v16 = vpop.permute.xlu1 %467  ;;  %v509_v33 = vsel %vm280_vm2, %v498_v24, %v508_v31 }
 0x3a4   :  { %v502_v29 = vrot.slane %v468_v16, %v1242_v3 }
 0x3a7   :  { %v471_v26 = vpop.permute.xlu1 %470 }
 0x3a8   :  { %v506_v30 = vrot.slane %v471_v26, %v1245_v5 }
 0x3aa   :  { %v507_v32 = vsel %vm249_vm0, %v506_v30, %v502_v29 }
 0x3ab   :  { %v510_v34 = vsel %vm282_vm3, %v507_v32, %v509_v33 }
 0x3ac   :  { %v512_v35 = vsel %vm285_vm4, %v510_v34, -inf }
 0x3ad   :  { %513 = vmax.xlane.f32.xlu1 %v512_v35 }
 0x436   :  { %v1334_v36 = vpop.xlane.xlu1 %513 }
 0x437   :  { %v532_v37 = vrot.slane %v1334_v36, %v1260_v27  ;;  %v520_v38 = vrot.slane %v1334_v36, %v1248_v20  ;;  %v524_v40 = vrot.slane %v1334_v36, %v1252_v22  ;;  %v528_v43 = vrot.slane %v1334_v36, %v1256_v25 }
 0x439   :  { %vm544_vm10 = vcmp.eq.f32.partialorder %v439_v6, %v532_v37  ;;  %vm537_vm11 = vcmp.eq.f32.partialorder %v432_v59, %v520_v38  ;;  %vm538_vm12 = vcmp.eq.f32.partialorder %v433_v61, %v520_v38  ;;  %vm539_vm13 = vcmp.eq.f32.partialorder %v434_v62, %v524_v40 }
 0x43a   :  { %v1340_v39 = vsel %vm544_vm10, 0.0, %v439_v6  ;;  %v545_v1 = vsel %vm537_vm11, 0.0, %v432_v59  ;;  %v546_v41 = vsel %vm538_vm12, 0.0, %v433_v61  ;;  %v547_v42 = vsel %vm539_vm13, 0.0, %v434_v62 }
 0x43b   :  { %583 = vperm.xlu1 %1116, %v1340_v39   ;;  %562 = vperm.xlu0 %1115, %v545_v1   ;;  %vm540_vm14 = vcmp.eq.f32.partialorder %v435_v63, %v524_v40  ;;  %vm541_vm15 = vcmp.eq.f32.partialorder %v1311_v58, %v528_v43  ;;  %vm542_vm5 = vcmp.eq.f32.partialorder %v437_v2, %v528_v43 }
 0x43c   :  { %v548_v44 = vsel %vm540_vm14, 0.0, %v435_v63  ;;  %v549_v45 = vsel %vm541_vm15, 0.0, %v1311_v58  ;;  %v550_v46 = vsel %vm542_vm5, 0.0, %v437_v2  ;;  %vm543_vm6 = vcmp.eq.f32.partialorder %v438_v4, %v532_v37 }
 0x43d   :  { %v551_v47 = vsel %vm543_vm6, 0.0, %v438_v4 }
 0x43f   :  { %565 = vperm.xlu0 %1115, %v546_v41  }
 0x443   :  { %568 = vperm.xlu0 %1115, %v547_v42  }
 0x447   :  { %571 = vperm.xlu0 %1115, %v548_v44  }
 0x44b   :  { %574 = vperm.xlu0 %1115, %v549_v45  }
 0x44f   :  { %577 = vperm.xlu0 %1115, %v550_v46  }
 0x453   :  { %580 = vperm.xlu0 %1115, %v551_v47  }
 0x4b6   :  { %v563_v48 = vpop.permute.xlu0 %562  ;;  %v584_v59 = vpop.permute.xlu1 %583 }
 0x4b7   :  { %v588_v61 = vrot.slane %v563_v48, %v1242_v3  ;;  %v619_v2 = vrot.slane %v584_v59, %v1245_v5 }
 0x4ba   :  { %v566_v49 = vpop.permute.xlu0 %565 }
 0x4bb   :  { %v592_v56 = vrot.slane %v566_v49, %v1245_v5 }
 0x4bd   :  { %v593_v4 = vsel %vm249_vm0, %v592_v56, %v588_v61 }
 0x4be   :  { %v569_v50 = vpop.permute.xlu0 %568 }
 0x4bf   :  { %v597_v57 = vrot.slane %v569_v50, %v1242_v3 }
 0x4c2   :  { %v572_v51 = vpop.permute.xlu0 %571 }
 0x4c3   :  { %v601_v53 = vrot.slane %v572_v51, %v1245_v5 }
 0x4c5   :  { %v602_v62 = vsel %vm249_vm0, %v601_v53, %v597_v57 }
 0x4c6   :  { %v575_v52 = vpop.permute.xlu0 %574  ;;  %v621_v7 = vsel %vm278_vm1, %v602_v62, %v593_v4 }
 0x4c7   :  { %v606_v60 = vrot.slane %v575_v52, %v1242_v3 }
 0x4ca   :  { %v578_v54 = vpop.permute.xlu0 %577 }
 0x4cb   :  { %v610_v58 = vrot.slane %v578_v54, %v1245_v5 }
 0x4cd   :  { %v611_v63 = vsel %vm249_vm0, %v610_v58, %v606_v60 }
 0x4ce   :  { %v581_v0 = vpop.permute.xlu0 %580  ;;  %v622_v9 = vsel %vm280_vm2, %v611_v63, %v621_v7 }
 0x4cf   :  { %v615_v6 = vrot.slane %v581_v0, %v1242_v3 }
 0x4d1   :  { %v620_v8 = vsel %vm249_vm0, %v619_v2, %v615_v6 }
 0x4d2   :  { %v623_v10 = vsel %vm282_vm3, %v620_v8, %v622_v9 }
 0x4d3   :  { %v625_v11 = vsel %vm285_vm4, %v623_v10, -inf }
 0x4d4   :  { %626 = vmax.xlane.f32.xlu0 %v625_v11 }
 0x55d   :  { %v1365_v12 = vpop.xlane.xlu0 %626 }
 0x55e   :  { %v641_v13 = vrot.slane %v1365_v12, %v1256_v25  ;;  %v633_v14 = vrot.slane %v1365_v12, %v1248_v20  ;;  %v637_v18 = vrot.slane %v1365_v12, %v1252_v22  ;;  %v645_v24 = vrot.slane %v1365_v12, %v1260_v27 }
 0x560   :  { %vm654_vm7 = vcmp.eq.f32.partialorder %v549_v45, %v641_v13  ;;  %vm650_vm8 = vcmp.eq.f32.partialorder %v545_v1, %v633_v14  ;;  %vm651_vm9 = vcmp.eq.f32.partialorder %v546_v41, %v633_v14  ;;  %vm652_vm10 = vcmp.eq.f32.partialorder %v547_v42, %v637_v18 }
 0x561   :  { %v1371_v16 = vsel %vm654_vm7, 0.0, %v549_v45  ;;  %v658_v17 = vsel %vm650_vm8, 0.0, %v545_v1  ;;  %v659_v19 = vsel %vm651_vm9, 0.0, %v546_v41  ;;  %v660_v21 = vsel %vm652_vm10, 0.0, %v547_v42 }
 0x562   :  { %687 = vperm.xlu0 %1115, %v1371_v16   ;;  %675 = vperm.xlu1 %1116, %v658_v17   ;;  %vm653_vm11 = vcmp.eq.f32.partialorder %v548_v44, %v637_v18  ;;  %vm655_vm12 = vcmp.eq.f32.partialorder %v550_v46, %v641_v13  ;;  %vm656_vm13 = vcmp.eq.f32.partialorder %v551_v47, %v645_v24 }
 0x563   :  { %v661_v23 = vsel %vm653_vm11, 0.0, %v548_v44  ;;  %v663_v26 = vsel %vm655_vm12, 0.0, %v550_v46  ;;  %v664_v28 = vsel %vm656_vm13, 0.0, %v551_v47  ;;  %vm657_vm14 = vcmp.eq.f32.partialorder %v1340_v39, %v645_v24 }
 0x564   :  { %v665_v29 = vsel %vm657_vm14, 0.0, %v1340_v39 }
 0x566   :  { %678 = vperm.xlu1 %1116, %v659_v19  }
 0x56a   :  { %681 = vperm.xlu1 %1116, %v660_v21  }
 0x56e   :  { %684 = vperm.xlu1 %1116, %v661_v23  }
 0x572   :  { %690 = vperm.xlu1 %1116, %v663_v26  }
 0x576   :  { %693 = vperm.xlu1 %1116, %v664_v28  }
 0x57a   :  { %696 = vperm.xlu1 %1116, %v665_v29  }
 0x5dd   :  { %v676_v30 = vpop.permute.xlu1 %675  ;;  %v688_v35 = vpop.permute.xlu0 %687 }
 0x5de   :  { %v719_v42 = vrot.slane %v688_v35, %v1242_v3  ;;  %v701_v39 = vrot.slane %v676_v30, %v1242_v3 }
 0x5e1   :  { %v679_v31 = vpop.permute.xlu1 %678 }
 0x5e2   :  { %v705_v40 = vrot.slane %v679_v31, %v1245_v5 }
 0x5e4   :  { %v706_v46 = vsel %vm249_vm0, %v705_v40, %v701_v39 }
 0x5e5   :  { %v682_v32 = vpop.permute.xlu1 %681 }
 0x5e6   :  { %v710_v41 = vrot.slane %v682_v32, %v1242_v3 }
 0x5e9   :  { %v685_v33 = vpop.permute.xlu1 %684 }
 0x5ea   :  { %v714_v37 = vrot.slane %v685_v33, %v1245_v5 }
 0x5ec   :  { %v715_v43 = vsel %vm249_vm0, %v714_v37, %v710_v41 }
 0x5ed   :  { %v691_v34 = vpop.permute.xlu1 %690  ;;  %v734_v49 = vsel %vm278_vm1, %v715_v43, %v706_v46 }
 0x5ee   :  { %v723_v38 = vrot.slane %v691_v34, %v1245_v5 }
 0x5f0   :  { %v724_v44 = vsel %vm249_vm0, %v723_v38, %v719_v42 }
 0x5f1   :  { %v694_v1 = vpop.permute.xlu1 %693  ;;  %v735_v51 = vsel %vm280_vm2, %v724_v44, %v734_v49 }
 0x5f2   :  { %v728_v47 = vrot.slane %v694_v1, %v1242_v3 }
 0x5f5   :  { %v697_v45 = vpop.permute.xlu1 %696 }
 0x5f6   :  { %v732_v48 = vrot.slane %v697_v45, %v1245_v5 }
 0x5f8   :  { %v733_v50 = vsel %vm249_vm0, %v732_v48, %v728_v47 }
 0x5f9   :  { %v736_v52 = vsel %vm282_vm3, %v733_v50, %v735_v51 }
 0x5fa   :  { %v738_v53 = vsel %vm285_vm4, %v736_v52, -inf }
 0x5fb   :  { %739 = vmax.xlane.f32.xlu1 %v738_v53 }
 0x684   :  { %v1396_v54 = vpop.xlane.xlu1 %739 }
 0x685   :  { %v758_v56 = vrot.slane %v1396_v54, %v1260_v27  ;;  %v746_v57 = vrot.slane %v1396_v54, %v1248_v20  ;;  %v750_v60 = vrot.slane %v1396_v54, %v1252_v22  ;;  %v754_v63 = vrot.slane %v1396_v54, %v1256_v25 }
 0x687   :  { %vm770_vm15 = vcmp.eq.f32.partialorder %v665_v29, %v758_v56  ;;  %vm763_vm5 = vcmp.eq.f32.partialorder %v658_v17, %v746_v57  ;;  %vm764_vm6 = vcmp.eq.f32.partialorder %v659_v19, %v746_v57  ;;  %vm765_vm7 = vcmp.eq.f32.partialorder %v660_v21, %v750_v60 }
 0x688   :  { %v1402_v58 = vsel %vm770_vm15, 0.0, %v665_v29  ;;  %v771_v59 = vsel %vm763_vm5, 0.0, %v658_v17  ;;  %v772_v61 = vsel %vm764_vm6, 0.0, %v659_v19  ;;  %v773_v62 = vsel %vm765_vm7, 0.0, %v660_v21 }
 0x689   :  { %809 = vperm.xlu1 %1116, %v1402_v58   ;;  %788 = vperm.xlu0 %1115, %v771_v59   ;;  %vm766_vm8 = vcmp.eq.f32.partialorder %v661_v23, %v750_v60  ;;  %vm767_vm9 = vcmp.eq.f32.partialorder %v1371_v16, %v754_v63  ;;  %vm768_vm10 = vcmp.eq.f32.partialorder %v663_v26, %v754_v63 }
 0x68a   :  { %v774_v0 = vsel %vm766_vm8, 0.0, %v661_v23  ;;  %v775_v2 = vsel %vm767_vm9, 0.0, %v1371_v16  ;;  %v776_v4 = vsel %vm768_vm10, 0.0, %v663_v26  ;;  %vm769_vm11 = vcmp.eq.f32.partialorder %v664_v28, %v758_v56 }
 0x68b   :  { %v777_v6 = vsel %vm769_vm11, 0.0, %v664_v28 }
 0x68d   :  { %791 = vperm.xlu0 %1115, %v772_v61  }
 0x691   :  { %794 = vperm.xlu0 %1115, %v773_v62  }
 0x695   :  { %797 = vperm.xlu0 %1115, %v774_v0  }
 0x699   :  { %800 = vperm.xlu0 %1115, %v775_v2  }
 0x69d   :  { %803 = vperm.xlu0 %1115, %v776_v4  }
 0x6a1   :  { %806 = vperm.xlu0 %1115, %v777_v6  }
 0x704   :  { %v789_v7 = vpop.permute.xlu0 %788  ;;  %v810_v19 = vpop.permute.xlu1 %809 }
 0x705   :  { %v814_v23 = vrot.slane %v789_v7, %v1242_v3  ;;  %v845_v29 = vrot.slane %v810_v19, %v1245_v5 }
 0x708   :  { %v792_v8 = vpop.permute.xlu0 %791 }
 0x709   :  { %v818_v17 = vrot.slane %v792_v8, %v1245_v5 }
 0x70b   :  { %v819_v30 = vsel %vm249_vm0, %v818_v17, %v814_v23 }
 0x70c   :  { %v795_v9 = vpop.permute.xlu0 %794 }
 0x70d   :  { %v823_v18 = vrot.slane %v795_v9, %v1242_v3 }
 0x710   :  { %v798_v10 = vpop.permute.xlu0 %797 }
 0x711   :  { %v827_v13 = vrot.slane %v798_v10, %v1245_v5 }
 0x713   :  { %v828_v24 = vsel %vm249_vm0, %v827_v13, %v823_v18 }
 0x714   :  { %v801_v11 = vpop.permute.xlu0 %800  ;;  %v847_v32 = vsel %vm278_vm1, %v828_v24, %v819_v30 }
 0x715   :  { %v832_v21 = vrot.slane %v801_v11, %v1242_v3 }
 0x718   :  { %v804_v14 = vpop.permute.xlu0 %803 }
 0x719   :  { %v836_v16 = vrot.slane %v804_v14, %v1245_v5 }
 0x71b   :  { %v837_v26 = vsel %vm249_vm0, %v836_v16, %v832_v21 }
 0x71c   :  { %v807_v28 = vpop.permute.xlu0 %806  ;;  %v848_v34 = vsel %vm280_vm2, %v837_v26, %v847_v32 }
 0x71d   :  { %v841_v31 = vrot.slane %v807_v28, %v1242_v3 }
 0x71f   :  { %v846_v33 = vsel %vm249_vm0, %v845_v29, %v841_v31 }
 0x720   :  { %v849_v35 = vsel %vm282_vm3, %v846_v33, %v848_v34 }
 0x721   :  { %v851_v37 = vsel %vm285_vm4, %v849_v35, -inf }
 0x722   :  { %852 = vmax.xlane.f32.xlu0 %v851_v37 }
 0x7ab   :  { %v1427_v38 = vpop.xlane.xlu0 %852 }
 0x7ac   :  { %v867_v1 = vrot.slane %v1427_v38, %v1256_v25  ;;  %v859_v40 = vrot.slane %v1427_v38, %v1248_v20  ;;  %v863_v39 = vrot.slane %v1427_v38, %v1252_v22  ;;  %v871_v46 = vrot.slane %v1427_v38, %v1260_v27 }
 0x7ae   :  { %vm880_vm12 = vcmp.eq.f32.partialorder %v775_v2, %v867_v1  ;;  %vm876_vm13 = vcmp.eq.f32.partialorder %v771_v59, %v859_v40  ;;  %vm877_vm14 = vcmp.eq.f32.partialorder %v772_v61, %v859_v40  ;;  %vm878_vm15 = vcmp.eq.f32.partialorder %v773_v62, %v863_v39 }
 0x7af   :  { %v1433_v41 = vsel %vm880_vm12, 0.0, %v775_v2  ;;  %v884_v42 = vsel %vm876_vm13, 0.0, %v771_v59  ;;  %v885_v43 = vsel %vm877_vm14, 0.0, %v772_v61  ;;  %v886_v44 = vsel %vm878_vm15, 0.0, %v773_v62 }
 0x7b0   :  { %913 = vperm.xlu0 %1115, %v1433_v41   ;;  %901 = vperm.xlu1 %1116, %v884_v42   ;;  %vm879_vm5 = vcmp.eq.f32.partialorder %v774_v0, %v863_v39  ;;  %vm881_vm6 = vcmp.eq.f32.partialorder %v776_v4, %v867_v1  ;;  %vm882_vm7 = vcmp.eq.f32.partialorder %v777_v6, %v871_v46 }
 0x7b1   :  { %v887_v45 = vsel %vm879_vm5, 0.0, %v774_v0  ;;  %v889_v47 = vsel %vm881_vm6, 0.0, %v776_v4  ;;  %v890_v48 = vsel %vm882_vm7, 0.0, %v777_v6  ;;  %vm883_vm8 = vcmp.eq.f32.partialorder %v1402_v58, %v871_v46 }
 0x7b2   :  { %v891_v49 = vsel %vm883_vm8, 0.0, %v1402_v58 }
 0x7b4   :  { %904 = vperm.xlu1 %1116, %v885_v43  }
 0x7b8   :  { %907 = vperm.xlu1 %1116, %v886_v44  }
 0x7bc   :  { %910 = vperm.xlu1 %1116, %v887_v45  }
 0x7c0   :  { %916 = vperm.xlu1 %1116, %v889_v47  }
 0x7c4   :  { %919 = vperm.xlu1 %1116, %v890_v48  }
 0x7c8   :  { %922 = vperm.xlu1 %1116, %v891_v49  }
 0x82b   :  { %v902_v50 = vpop.permute.xlu1 %901  ;;  %v914_v57 = vpop.permute.xlu0 %913 }
 0x82c   :  { %v945_v0 = vrot.slane %v914_v57, %v1242_v3  ;;  %v927_v58 = vrot.slane %v902_v50, %v1242_v3  ;;  %v402_v57 = vadd.f32 %v1305_v55, %v1279_v15 }
 0x82f   :  { %v905_v51 = vpop.permute.xlu1 %904 }
 0x830   :  { %v931_v62 = vrot.slane %v905_v51, %v1245_v5 }
 0x832   :  { %v932_v7 = vsel %vm249_vm0, %v931_v62, %v927_v58 }
 0x833   :  { %v908_v52 = vpop.permute.xlu1 %907 }
 0x834   :  { %v936_v63 = vrot.slane %v908_v52, %v1242_v3 }
 0x837   :  { %v911_v53 = vpop.permute.xlu1 %910 }
 0x838   :  { %v940_v59 = vrot.slane %v911_v53, %v1245_v5 }
 0x83a   :  { %v941_v2 = vsel %vm249_vm0, %v940_v59, %v936_v63 }
 0x83b   :  { %v917_v56 = vpop.permute.xlu1 %916  ;;  %v960_v10 = vsel %vm278_vm1, %v941_v2, %v932_v7 }
 0x83c   :  { %v949_v60 = vrot.slane %v917_v56, %v1245_v5 }
 0x83e   :  { %v950_v4 = vsel %vm249_vm0, %v949_v60, %v945_v0 }
 0x83f   :  { %v920_v61 = vpop.permute.xlu1 %919  ;;  %v961_v13 = vsel %vm280_vm2, %v950_v4, %v960_v10 }
 0x840   :  { %v954_v8 = vrot.slane %v920_v61, %v1242_v3 }
 0x843   :  { %v923_v6 = vpop.permute.xlu1 %922 }
 0x844   :  { %v958_v9 = vrot.slane %v923_v6, %v1245_v5 }
 0x846   :  { %v959_v11 = vsel %vm249_vm0, %v958_v9, %v954_v8 }
 0x847   :  { %v962_v14 = vsel %vm282_vm3, %v959_v11, %v961_v13 }
 0x848   :  { %v964_v17 = vsel %vm285_vm4, %v962_v14, -inf }
 0x849   :  { %965 = vmax.xlane.f32.xlu1 %v964_v17 }
 0x8d2   :  { %v966_v18 = vpop.xlane.xlu1 %965 }
 0x8d3   :  { %v984_v16 = vrot.slane %v966_v18, %v1260_v27  ;;  %v972_v19 = vrot.slane %v966_v18, %v1248_v20  ;;  %v976_v24 = vrot.slane %v966_v18, %v1252_v22  ;;  %v980_v29 = vrot.slane %v966_v18, %v1256_v25 }
 0x8d5   :  { %vm996_vm9 = vcmp.eq.f32.partialorder %v891_v49, %v984_v16  ;;  %vm989_vm10 = vcmp.eq.f32.partialorder %v884_v42, %v972_v19  ;;  %vm990_vm11 = vcmp.eq.f32.partialorder %v885_v43, %v972_v19  ;;  %vm991_vm12 = vcmp.eq.f32.partialorder %v886_v44, %v976_v24 }
 0x8d6   :  { %v1004_v21 = vsel %vm996_vm9, 0.0, %v891_v49  ;;  %v997_v23 = vsel %vm989_vm10, 0.0, %v884_v42  ;;  %v998_v26 = vsel %vm990_vm11, 0.0, %v885_v43  ;;  %v999_v28 = vsel %vm991_vm12, 0.0, %v886_v44 }
 0x8d7   :  { %1035 = vperm.xlu1 %1116, %v1004_v21   ;;  %1014 = vperm.xlu0 %1115, %v997_v23   ;;  %vm992_vm13 = vcmp.eq.f32.partialorder %v887_v45, %v976_v24  ;;  %vm993_vm14 = vcmp.eq.f32.partialorder %v1433_v41, %v980_v29  ;;  %vm994_vm15 = vcmp.eq.f32.partialorder %v889_v47, %v980_v29 }
 0x8d8   :  { %v1000_v27 = vsel %vm992_vm13, 0.0, %v887_v45  ;;  %v1001_v20 = vsel %vm993_vm14, 0.0, %v1433_v41  ;;  %v1002_v30 = vsel %vm994_vm15, 0.0, %v889_v47  ;;  %vm995_vm5 = vcmp.eq.f32.partialorder %v890_v48, %v984_v16 }
 0x8d9   :  { %v1003_v22 = vsel %vm995_vm5, 0.0, %v890_v48 }
 0x8db   :  { %1017 = vperm.xlu0 %1115, %v998_v26  }
 0x8df   :  { %1020 = vperm.xlu0 %1115, %v999_v28  }
 0x8e3   :  { %1023 = vperm.xlu0 %1115, %v1000_v27  }
 0x8e7   :  { %1026 = vperm.xlu0 %1115, %v1001_v20  }
 0x8eb   :  { %1029 = vperm.xlu0 %1115, %v1002_v30  }
 0x8ef   :  { %1032 = vperm.xlu0 %1115, %v1003_v22  }
 0x952   :  { %v1015_v31 = vpop.permute.xlu0 %1014  ;;  %v1036_v42 = vpop.permute.xlu1 %1035 }
 0x953   :  { %v1040_v43 = vrot.slane %v1015_v31, %v1242_v3  ;;  %v1071_v47 = vrot.slane %v1036_v42, %v1245_v5 }
 0x956   :  { %v1018_v32 = vpop.permute.xlu0 %1017 }
 0x957   :  { %v1044_v1 = vrot.slane %v1018_v32, %v1245_v5 }
 0x959   :  { %v1045_v48 = vsel %vm249_vm0, %v1044_v1, %v1040_v43 }
 0x95a   :  { %v1021_v33 = vpop.permute.xlu0 %1020 }
 0x95b   :  { %v1049_v40 = vrot.slane %v1021_v33, %v1242_v3 }
 0x95e   :  { %v1024_v34 = vpop.permute.xlu0 %1023 }
 0x95f   :  { %v1053_v25 = vrot.slane %v1024_v34, %v1245_v5 }
 0x961   :  { %v1054_v44 = vsel %vm249_vm0, %v1053_v25, %v1049_v40 }
 0x962   :  { %v1027_v35 = vpop.permute.xlu0 %1026  ;;  %v1073_v50 = vsel %vm278_vm1, %v1054_v44, %v1045_v48  ;;  %vm1090_vm1 = vcmask 0  }
 0x963   :  { %v1058_v39 = vrot.slane %v1027_v35, %v1242_v3 }
 0x966   :  { %v1030_v37 = vpop.permute.xlu0 %1029 }
 0x967   :  { %v1062_v41 = vrot.slane %v1030_v37, %v1245_v5  ;;  %v515_v5 = vadd.f32 %v1334_v36, %v402_v57 }
 0x969   :  { %v1063_v45 = vsel %vm249_vm0, %v1062_v41, %v1058_v39  ;;  %v628_v59 = vadd.f32 %v1365_v12, %v515_v5 }
 0x96a   :  { %v1033_v46 = vpop.permute.xlu0 %1032  ;;  %v1074_v52 = vsel %vm280_vm2, %v1063_v45, %v1073_v50 }
 0x96b   :  { %v1067_v49 = vrot.slane %v1033_v46, %v1242_v3  ;;  %v741_v3 = vadd.f32 %v1396_v54, %v628_v59 }
 0x96d   :  { %v1072_v51 = vsel %vm249_vm0, %v1071_v47, %v1067_v49  ;;  %v854_v60 = vadd.f32 %v1427_v38, %v741_v3  ;;  %vm1081_vm0 = vcmask 1043456  }
 0x96e   :  { %v1075_v53 = vsel %vm282_vm3, %v1072_v51, %v1074_v52 }
 0x96f   :  { %v1077_v56 = vsel %vm285_vm4, %v1075_v53, -inf  ;;  %v967_v61 = vadd.f32 %v966_v18, %v854_v60 }
 0x970   :  { %1078 = vmax.xlane.f32.xlu0 %v1077_v56 }
 0x9f9   :  { %v1079_v62 = vpop.xlane.xlu0 %1078 }
 0x9fa   :  { %v1080_v63 = vadd.f32 %v1079_v62, %v967_v61 }
 0x9fc   :  { %v1082_v0 = vsel %vm1081_vm0, %v1080_v63, 0.0 }
 0x9fd   :  { %v1083_v58 = vrot.slane %v1082_v0, 4 }
 0x9ff   :  { %v1084_v2 = vadd.f32 %v1083_v58, %v1082_v0 }
 0xa01   :  { %v1085_v4 = vrot.slane %v1084_v2, 2 }
 0xa03   :  { %v1086_v6 = vadd.f32 %v1085_v4, %v1084_v2 }
 0xa05   :  { %v1087_v7 = vrot.slane %v1086_v6, 1 }
 0xa07   :  { %v1088_v15 = vadd.f32 %v1087_v7, %v1086_v6 }
 0xa09   :  { %v1089_v55 = vmul.f32 0.03125, %v1088_v15 }
 0xa0b   :  { %1091 = vst.msk [vmem:[#allocation8] sm:$0x1] %vm1090_vm1, %v1089_v55 }
 0xa0c   :  { %1188 = shalt.err (!%p1185_p5)
}
 0xa0d   :  { %1101 = dma.vmem_to_hbm [thread:$0]  %s1099_s2, 16, %s1492_s3, [#allocation4]  }
 0xa0e   :  { %1201 = dma.done.wait [#allocation4], 16  }
 0xa0f   :  { %1202 = vsyncadd [#allocation4], 4294967280 }
 0xa10   :  { %1105 = vsyncpa [#allocation3], 1 }
 0xa11   :  { %1106 = vsyncpa [#allocation6], 1 }
 0xa12   :  { %1107 = vsyncpa [#allocation4], 1 }

</bundles_post_ra>
